<compile_context>
chip_gen: v6e
topology: v6e:2x2x1
jax: 0.10.0
libtpu: 0.0.40
codegen_flags: <defaults>
</compile_context>

<pallas_src>
import functools

import jax
import jax.numpy as jnp
from jax.experimental import pallas as pl
from jax.experimental.pallas import tpu as pltpu

# ---------------- module hyper-parameters (from SphGSA.__init__) ----------------
DIM_IN = 8
DIM_OUT = 8
HEADS = 2
DIM_HEAD = 16
K = 4                      # patch size for to_kv (kernel=k, stride=k)
INNER = HEADS * DIM_HEAD   # 32
SCALE = DIM_HEAD ** (-0.5)


# ------------------------------ fused Pallas kernel ------------------------------
def sph_gsa_kernel(fm_ref, patches_ref, wq_ref, wk_ref, wv_ref, wo_ref, bo_ref,
                   out_ref, k_sc, v_sc, *, heads, dim_head):
    """One grid step = (one batch element, one tile of TQ query positions).

    fm_ref      : (1, n, TQ)              channel-major activation tile (for to_q)
    patches_ref : (1, w, n*k*k)           im2col patches for this batch (resident over y-tiles)
    wq_ref      : (inner, n)              to_q weight (scale pre-folded), channel-major
    wk_ref      : (heads, n*k*k, d)       to_kv K half, per head, matmul-ready
    wv_ref      : (heads, d, n*k*k)       to_kv V half, per head, channel-major
    wo_ref      : (heads, dim_out, d)     to_out weight, per head, channel-major
    bo_ref      : (dim_out, 1)            to_out bias column
    out_ref     : (1, dim_out, TQ)        channel-major, lane-dense output tile
    k_sc        : VMEM (heads, w, d)      K, resident across y-tiles
    v_sc        : VMEM (heads, d, w)      V (channel-major), resident across y-tiles
    """
    qt = pl.program_id(1)

    # ---- to_kv: computed once per batch (y-tile 0), kept in VMEM scratch ----
    @pl.when(qt == 0)
    def _():
        pt = patches_ref[0]                                              # (w, n*k*k)
        for h in range(heads):                                           # static unroll
            k_sc[h] = jnp.dot(pt, wk_ref[h],
                              preferred_element_type=jnp.float32)        # (w, d)
            # V channel-major: contract the shared n*k*k axis (q@k^T-style dot).
            v_sc[h] = jax.lax.dot_general(
                wv_ref[h], pt, (((1,), (1,)), ((), ())),
                preferred_element_type=jnp.float32)                      # (d, w)

    # ---- to_q on this tile: channel-major (inner, TQ); scale already in wq ----
    q = jnp.dot(wq_ref[...], fm_ref[0],
                preferred_element_type=jnp.float32)                      # (inner, TQ)

    # ---- per-head attention + fused output projection (accumulated) ----
    acc = jnp.zeros(out_ref.shape[1:], dtype=jnp.float32)                # (dim_out, TQ)
    for h in range(heads):                                               # static unroll
        q_h = q[h * dim_head:(h + 1) * dim_head, :]                      # (d, TQ) sublane slice
        k_h = k_sc[h]                                                    # (w, d)
        v_h = v_sc[h]                                                    # (d, w)

        s = jnp.dot(k_h, q_h, preferred_element_type=jnp.float32)        # (w, TQ) == dots^T
        m = jnp.max(s, axis=0, keepdims=True)                            # (1, TQ)
        p = jnp.exp(s - m)                                               # (w, TQ)
        l = jnp.sum(p, axis=0, keepdims=True)                            # (1, TQ)
        o = jnp.dot(v_h, p, preferred_element_type=jnp.float32)          # (d, TQ)
        o = o * pl.reciprocal(l, approx=True)                            # softmax denom on EUP

        acc = acc + jnp.dot(wo_ref[h], o,
                            preferred_element_type=jnp.float32)          # (dim_out, TQ)

    out_ref[0] = (acc + bo_ref[...]).astype(out_ref.dtype)


def _pick_query_tile(y):
    """Largest lane-dense query tile; K/V stay resident so any split is valid."""
    if y <= 1024:
        return y
    for cand in (1024, 512, 256, 128):
        if y % cand == 0:
            return cand
    return y   # TODO(synk): pad/mask ragged y so huge non-divisible npix still tiles


# ---------------------------------- wrapper --------------------------------------
def sph_gsa_forward(fmap, params):
    b, n, x, y = fmap.shape
    assert x == 1, "SphGSA einsum only well-defined for x == 1 (HEALPix layout)"
    kk = K * K
    assert y % kk == 0
    w = y // kk
    inner = INNER

    tq = _pick_query_tile(y)
    num_q_tiles = y // tq
    # TODO(synk): for very large npix (resident K/V + patches approaching scoped
    # VMEM, first on v7x's 64 MiB), also tile w with an online flash-style softmax
    # and raise vmem_limit_bytes via pltpu.CompilerParams.

    fm = fmap.reshape(b, n, y).astype(jnp.float32)       # metadata-only (x == 1)

    # im2col for the k x k / stride-k to_kv conv: (b, w, n*k*k), lane-dense last dim.
    # This data reorganization is inherent to the patch conv; done once in XLA.
    patches = (fm.reshape(b, n, w, kk)
                 .transpose(0, 2, 1, 3)
                 .reshape(b, w, n * kk))

    # Weight layouts chosen so every in-kernel dot is MXU-native and every
    # per-head access is a leading-dim index (no lane slicing in the kernel).
    wq_cm = params["wq"][:, :, 0, 0].astype(jnp.float32) * SCALE           # (inner, n)
    wkv_flat = params["wkv"].reshape(2 * inner, n * kk).astype(jnp.float32)
    wk_ph = wkv_flat[:inner].reshape(HEADS, DIM_HEAD, n * kk).transpose(0, 2, 1)  # (h, n*k*k, d)
    wv_ph = wkv_flat[inner:].reshape(HEADS, DIM_HEAD, n * kk)                     # (h, d, n*k*k)
    wo_ph = (params["wo"][:, :, 0, 0].astype(jnp.float32)
             .reshape(DIM_OUT, HEADS, DIM_HEAD).transpose(1, 0, 2))               # (h, dim_out, d)
    bo_col = params["bo"].reshape(DIM_OUT, 1).astype(jnp.float32)                 # (dim_out, 1)

    kernel = functools.partial(sph_gsa_kernel, heads=HEADS, dim_head=DIM_HEAD)

    out_cm = pl.pallas_call(
        kernel,
        out_shape=jax.ShapeDtypeStruct((b, DIM_OUT, y), jnp.float32),
        grid_spec=pltpu.PrefetchScalarGridSpec(
            num_scalar_prefetch=0,
            grid=(b, num_q_tiles),
            in_specs=[
                pl.BlockSpec((1, n, tq), lambda bi, qi: (bi, 0, qi)),           # fm tile
                pl.BlockSpec((1, w, n * kk), lambda bi, qi: (bi, 0, 0)),        # patches/batch
                pl.BlockSpec((inner, n), lambda bi, qi: (0, 0)),                # wq (resident)
                pl.BlockSpec((HEADS, n * kk, DIM_HEAD), lambda bi, qi: (0, 0, 0)),  # wk
                pl.BlockSpec((HEADS, DIM_HEAD, n * kk), lambda bi, qi: (0, 0, 0)),  # wv
                pl.BlockSpec((HEADS, DIM_OUT, DIM_HEAD), lambda bi, qi: (0, 0, 0)), # wo
                pl.BlockSpec((DIM_OUT, 1), lambda bi, qi: (0, 0)),              # bo
            ],
            out_specs=pl.BlockSpec((1, DIM_OUT, tq), lambda bi, qi: (bi, 0, qi)),
            scratch_shapes=[
                pltpu.VMEM((HEADS, w, DIM_HEAD), jnp.float32),   # K per head
                pltpu.VMEM((HEADS, DIM_HEAD, w), jnp.float32),   # V per head (channel-major)
            ],
        ),
        compiler_params=pltpu.CompilerParams(
            dimension_semantics=("parallel", "arbitrary")),
    )(fm, patches, wq_cm, wk_ph, wv_ph, wo_ph, bo_col)

    # (b, dim_out, y) -> NCHW (b, dim_out, 1, y): metadata-only, no transpose.
    return out_cm.reshape(b, DIM_OUT, 1, y)


# ------------------------ pure-JAX reference (for check) ------------------------
def sph_gsa_reference(fmap, params):
    b, n, _, y = fmap.shape
    h, d, kk = HEADS, DIM_HEAD, K
    w = y // (kk * kk)
    inner = h * d
    wq, wkv, wo, bo = params["wq"], params["wkv"], params["wo"], params["bo"]
    fm = fmap[:, :, 0, :]                                               # [b, n, y]
    q = jnp.einsum("bcy,oc->boy", fm, wq[:, :, 0, 0])                   # [b, inner, y]
    patches = fm.reshape(b, n, w, kk * kk)
    kv = jnp.einsum("bnwp,onp->bow", patches, wkv.reshape(2 * inner, n, kk * kk))
    kmat, vmat = kv[:, :inner], kv[:, inner:]
    qh = q.reshape(b, h, d, y).transpose(0, 1, 3, 2)                    # [b, h, y, d]
    kh = kmat.reshape(b, h, d, w).transpose(0, 1, 3, 2)                 # [b, h, w, d]
    vh = vmat.reshape(b, h, d, w).transpose(0, 1, 3, 2)
    dots = jnp.einsum("bhid,bhjd->bhij", qh, kh) * SCALE
    attn = jax.nn.softmax(dots, axis=-1)
    out = jnp.einsum("bhij,bhjd->bhid", attn, vh)                       # [b, h, y, d]
    out_c = out.transpose(0, 1, 3, 2).reshape(b, inner, y)              # [b, inner, y]
    fin = jnp.einsum("boy,po->bpy", out_c, wo[:, :, 0, 0]) + bo[None, :, None]
    return fin.reshape(b, DIM_OUT, 1, y)


# ------------------------------------ main ---------------------------------------
if __name__ == "__main__":
    key = jax.random.PRNGKey(0)
    k1, k2, k3, k4, k5, k6 = jax.random.split(key, 6)

    # deterministic synthetic parameters (shapes per SphGSA.__init__)
    params = {
        "wq": jax.random.normal(k1, (INNER, DIM_IN, 1, 1), jnp.float32) * 0.05,
        "wkv": jax.random.normal(k2, (2 * INNER, DIM_IN, K, K), jnp.float32) * 0.05,
        "wo": jax.random.normal(k3, (DIM_OUT, INNER, 1, 1), jnp.float32) * 0.05,
        "bo": jax.random.normal(k4, (DIM_OUT,), jnp.float32) * 0.05,
    }

    b = 2

    # (1) small spherical feature map: single query tile path
    y_small = 64
    fmap_small = jax.random.normal(k5, (b, DIM_IN, 1, y_small), jnp.float32)
    out = jax.block_until_ready(sph_gsa_forward(fmap_small, params))
    ref = jax.block_until_ready(sph_gsa_reference(fmap_small, params))
    assert out.shape == (b, DIM_OUT, 1, y_small), out.shape
    # Tolerance accounts for the approximate EUP reciprocal in the softmax denom.
    assert jnp.allclose(out, ref, atol=2e-3, rtol=2e-3), float(jnp.max(jnp.abs(out - ref)))

    # (2) larger npix: exercises the multi-y-tile path with K/V resident in VMEM scratch
    y_big = 2048
    fmap_big = jax.random.normal(k6, (b, DIM_IN, 1, y_big), jnp.float32)
    out_b = jax.block_until_ready(sph_gsa_forward(fmap_big, params))
    ref_b = jax.block_until_ready(sph_gsa_reference(fmap_big, params))
    assert out_b.shape == (b, DIM_OUT, 1, y_big), out_b.shape
    assert jnp.allclose(out_b, ref_b, atol=2e-3, rtol=2e-3), float(jnp.max(jnp.abs(out_b - ref_b)))

    print("KERNEL_OK")
</pallas_src>

<mosaic_0001>
module attributes {stable_mosaic.version = 11 : i64} {
  func.func @sph_gsa_kernel(%arg0: i32, %arg1: i32, %arg2: memref<1x8x64xf32, #tpu.memory_space<vmem>>, %arg3: memref<1x4x128xf32, #tpu.memory_space<vmem>>, %arg4: memref<32x8xf32, #tpu.memory_space<vmem>>, %arg5: memref<2x128x16xf32, #tpu.memory_space<vmem>>, %arg6: memref<2x16x128xf32, #tpu.memory_space<vmem>>, %arg7: memref<2x8x16xf32, #tpu.memory_space<vmem>>, %arg8: memref<8x1xf32, #tpu.memory_space<vmem>>, %arg9: memref<1x8x64xf32, #tpu.memory_space<vmem>>, %arg10: memref<2x4x16xf32, #tpu.memory_space<vmem>>, %arg11: memref<2x16x4xf32, #tpu.memory_space<vmem>>) attributes {dimension_semantics = [#tpu.dimension_semantics<parallel>, #tpu.dimension_semantics<arbitrary>], iteration_bounds = array<i64: 2, 1>, scalar_prefetch = 0 : i64, scratch_operands = 2 : i64, tpu.core_type = #tpu.core_type<tc>, window_params = [{transform_indices = @transform_0, window_bounds = array<i64: 1, 8, 64>}, {transform_indices = @transform_1, window_bounds = array<i64: 1, 4, 128>}, {pipeline_mode = #tpu.pipeline_mode<synchronous>, transform_indices = @transform_2, window_bounds = array<i64: 32, 8>}, {pipeline_mode = #tpu.pipeline_mode<synchronous>, transform_indices = @transform_3, window_bounds = array<i64: 2, 128, 16>}, {pipeline_mode = #tpu.pipeline_mode<synchronous>, transform_indices = @transform_4, window_bounds = array<i64: 2, 16, 128>}, {pipeline_mode = #tpu.pipeline_mode<synchronous>, transform_indices = @transform_5, window_bounds = array<i64: 2, 8, 16>}, {pipeline_mode = #tpu.pipeline_mode<synchronous>, transform_indices = @transform_6, window_bounds = array<i64: 8, 1>}, {transform_indices = @transform_7, window_bounds = array<i64: 1, 8, 64>}]} {
    %c0_i32 = arith.constant 0 : i32
    %0 = arith.cmpi eq, %arg1, %c0_i32 : i32
    %1 = arith.extui %0 : i1 to i32
    %c0_i32_0 = arith.constant 0 : i32
    %2 = arith.cmpi ne, %1, %c0_i32_0 : i32
    scf.if %2 {
      %c0_38 = arith.constant 0 : index
      %c0_39 = arith.constant 0 : index
      %c0_40 = arith.constant 0 : index
      %56 = vector.load %arg3[%c0_38, %c0_39, %c0_40] : memref<1x4x128xf32, #tpu.memory_space<vmem>>, vector<1x4x128xf32>
      %57 = vector.shape_cast %56 : vector<1x4x128xf32> to vector<4x128xf32>
      %c0_41 = arith.constant 0 : index
      %c0_42 = arith.constant 0 : index
      %c0_43 = arith.constant 0 : index
      %58 = vector.load %arg5[%c0_41, %c0_42, %c0_43] : memref<2x128x16xf32, #tpu.memory_space<vmem>>, vector<1x128x16xf32>
      %59 = vector.shape_cast %58 : vector<1x128x16xf32> to vector<128x16xf32>
      %cst_44 = arith.constant dense<0.000000e+00> : vector<4x16xf32>
      %60 = tpu.matmul %57, %59, %cst_44 {dimension_numbers = #tpu.dot_dimension_numbers<[1], [0], [0], [1], [0, 0, 1, 1], [], []>} : vector<4x128xf32>, vector<128x16xf32>, vector<4x16xf32> -> vector<4x16xf32>
      %c0_45 = arith.constant 0 : index
      %c0_46 = arith.constant 0 : index
      %c0_47 = arith.constant 0 : index
      %61 = vector.load %arg10[%c0_45, %c0_46, %c0_47] : memref<2x4x16xf32, #tpu.memory_space<vmem>>, vector<1x4x16xf32>
      %62 = vector.shape_cast %61 : vector<1x4x16xf32> to vector<4x16xf32>
      %63 = vector.shape_cast %60 : vector<4x16xf32> to vector<1x4x16xf32>
      tpu.vector_store %arg10[%c0_45, %c0_46, %c0_47], %63 {strides = array<i32>} : memref<2x4x16xf32, #tpu.memory_space<vmem>>, vector<1x4x16xf32>,
      %c0_48 = arith.constant 0 : index
      %c0_49 = arith.constant 0 : index
      %c0_50 = arith.constant 0 : index
      %64 = vector.load %arg6[%c0_48, %c0_49, %c0_50] : memref<2x16x128xf32, #tpu.memory_space<vmem>>, vector<1x16x128xf32>
      %65 = vector.shape_cast %64 : vector<1x16x128xf32> to vector<16x128xf32>
      %cst_51 = arith.constant dense<0.000000e+00> : vector<16x4xf32>
      %66 = tpu.matmul %65, %57, %cst_51 {dimension_numbers = #tpu.dot_dimension_numbers<[1], [1], [0], [0], [0, 0, 1, 0], [], []>} : vector<16x128xf32>, vector<4x128xf32>, vector<16x4xf32> -> vector<16x4xf32>
      %c0_52 = arith.constant 0 : index
      %c0_53 = arith.constant 0 : index
      %c0_54 = arith.constant 0 : index
      %67 = vector.load %arg11[%c0_52, %c0_53, %c0_54] : memref<2x16x4xf32, #tpu.memory_space<vmem>>, vector<1x16x4xf32>
      %68 = vector.shape_cast %67 : vector<1x16x4xf32> to vector<16x4xf32>
      %69 = vector.shape_cast %66 : vector<16x4xf32> to vector<1x16x4xf32>
      tpu.vector_store %arg11[%c0_52, %c0_53, %c0_54], %69 {strides = array<i32>} : memref<2x16x4xf32, #tpu.memory_space<vmem>>, vector<1x16x4xf32>,
      %c1_55 = arith.constant 1 : index
      %c0_56 = arith.constant 0 : index
      %c0_57 = arith.constant 0 : index
      %70 = vector.load %arg5[%c1_55, %c0_56, %c0_57] : memref<2x128x16xf32, #tpu.memory_space<vmem>>, vector<1x128x16xf32>
      %71 = vector.shape_cast %70 : vector<1x128x16xf32> to vector<128x16xf32>
      %cst_58 = arith.constant dense<0.000000e+00> : vector<4x16xf32>
      %72 = tpu.matmul %57, %71, %cst_58 {dimension_numbers = #tpu.dot_dimension_numbers<[1], [0], [0], [1], [0, 0, 1, 1], [], []>} : vector<4x128xf32>, vector<128x16xf32>, vector<4x16xf32> -> vector<4x16xf32>
      %c1_59 = arith.constant 1 : index
      %c0_60 = arith.constant 0 : index
      %c0_61 = arith.constant 0 : index
      %73 = vector.load %arg10[%c1_59, %c0_60, %c0_61] : memref<2x4x16xf32, #tpu.memory_space<vmem>>, vector<1x4x16xf32>
      %74 = vector.shape_cast %73 : vector<1x4x16xf32> to vector<4x16xf32>
      %75 = vector.shape_cast %72 : vector<4x16xf32> to vector<1x4x16xf32>
      tpu.vector_store %arg10[%c1_59, %c0_60, %c0_61], %75 {strides = array<i32>} : memref<2x4x16xf32, #tpu.memory_space<vmem>>, vector<1x4x16xf32>,
      %c1_62 = arith.constant 1 : index
      %c0_63 = arith.constant 0 : index
      %c0_64 = arith.constant 0 : index
      %76 = vector.load %arg6[%c1_62, %c0_63, %c0_64] : memref<2x16x128xf32, #tpu.memory_space<vmem>>, vector<1x16x128xf32>
      %77 = vector.shape_cast %76 : vector<1x16x128xf32> to vector<16x128xf32>
      %cst_65 = arith.constant dense<0.000000e+00> : vector<16x4xf32>
      %78 = tpu.matmul %77, %57, %cst_65 {dimension_numbers = #tpu.dot_dimension_numbers<[1], [1], [0], [0], [0, 0, 1, 0], [], []>} : vector<16x128xf32>, vector<4x128xf32>, vector<16x4xf32> -> vector<16x4xf32>
      %c1_66 = arith.constant 1 : index
      %c0_67 = arith.constant 0 : index
      %c0_68 = arith.constant 0 : index
      %79 = vector.load %arg11[%c1_66, %c0_67, %c0_68] : memref<2x16x4xf32, #tpu.memory_space<vmem>>, vector<1x16x4xf32>
      %80 = vector.shape_cast %79 : vector<1x16x4xf32> to vector<16x4xf32>
      %81 = vector.shape_cast %78 : vector<16x4xf32> to vector<1x16x4xf32>
      tpu.vector_store %arg11[%c1_66, %c0_67, %c0_68], %81 {strides = array<i32>} : memref<2x16x4xf32, #tpu.memory_space<vmem>>, vector<1x16x4xf32>,
    } else {
    }
    %c0 = arith.constant 0 : index
    %c0_1 = arith.constant 0 : index
    %3 = vector.load %arg4[%c0, %c0_1] : memref<32x8xf32, #tpu.memory_space<vmem>>, vector<32x8xf32>
    %c0_2 = arith.constant 0 : index
    %c0_3 = arith.constant 0 : index
    %c0_4 = arith.constant 0 : index
    %4 = vector.load %arg2[%c0_2, %c0_3, %c0_4] : memref<1x8x64xf32, #tpu.memory_space<vmem>>, vector<1x8x64xf32>
    %5 = vector.shape_cast %4 : vector<1x8x64xf32> to vector<8x64xf32>
    %cst = arith.constant dense<0.000000e+00> : vector<32x64xf32>
    %6 = tpu.matmul %3, %5, %cst {dimension_numbers = #tpu.dot_dimension_numbers<[1], [0], [0], [1], [0, 0, 1, 1], [], []>} : vector<32x8xf32>, vector<8x64xf32>, vector<32x64xf32> -> vector<32x64xf32>
    %cst_5 = arith.constant 0.000000e+00 : f32
    %7 = vector.broadcast %cst_5 : f32 to vector<8x64xf32>
    %8 = vector.extract_strided_slice %6 {offsets = [0, 0], sizes = [16, 64], strides = [1, 1]} : vector<32x64xf32> to vector<16x64xf32>
    %c0_6 = arith.constant 0 : index
    %c0_7 = arith.constant 0 : index
    %c0_8 = arith.constant 0 : index
    %9 = vector.load %arg10[%c0_6, %c0_7, %c0_8] : memref<2x4x16xf32, #tpu.memory_space<vmem>>, vector<1x4x16xf32>
    %10 = vector.shape_cast %9 : vector<1x4x16xf32> to vector<4x16xf32>
    %c0_9 = arith.constant 0 : index
    %c0_10 = arith.constant 0 : index
    %c0_11 = arith.constant 0 : index
    %11 = vector.load %arg11[%c0_9, %c0_10, %c0_11] : memref<2x16x4xf32, #tpu.memory_space<vmem>>, vector<1x16x4xf32>
    %12 = vector.shape_cast %11 : vector<1x16x4xf32> to vector<16x4xf32>
    %cst_12 = arith.constant dense<0.000000e+00> : vector<4x64xf32>
    %13 = tpu.matmul %10, %8, %cst_12 {dimension_numbers = #tpu.dot_dimension_numbers<[1], [0], [0], [1], [0, 0, 1, 1], [], []>} : vector<4x16xf32>, vector<16x64xf32>, vector<4x64xf32> -> vector<4x64xf32>
    %cst_13 = arith.constant dense<0xFF800000> : vector<64xf32>
    %14 = vector.multi_reduction <maximumf>, %13, %cst_13 [0] : vector<4x64xf32> to vector<64xf32>
    %15 = vector.shape_cast %14 : vector<64xf32> to vector<1x64xf32>
    %16 = vector.broadcast %15 : vector<1x64xf32> to vector<4x64xf32>
    %17 = arith.subf %13, %16 : vector<4x64xf32>
    %18 = math.exp %17 : vector<4x64xf32>
    %cst_14 = arith.constant dense<0.000000e+00> : vector<64xf32>
    %19 = vector.multi_reduction <add>, %18, %cst_14 [0] : vector<4x64xf32> to vector<64xf32>
    %20 = vector.shape_cast %19 : vector<64xf32> to vector<1x64xf32>
    %cst_15 = arith.constant dense<0.000000e+00> : vector<16x64xf32>
    %21 = tpu.matmul %12, %18, %cst_15 {dimension_numbers = #tpu.dot_dimension_numbers<[1], [0], [0], [1], [0, 0, 1, 1], [], []>} : vector<16x4xf32>, vector<4x64xf32>, vector<16x64xf32> -> vector<16x64xf32>
    %22 = tpu.reciprocal %20 {approx = true} : vector<1x64xf32> -> vector<1x64xf32>
    %23 = vector.broadcast %22 : vector<1x64xf32> to vector<16x64xf32>
    %24 = arith.mulf %21, %23 : vector<16x64xf32>
    %c0_16 = arith.constant 0 : index
    %c0_17 = arith.constant 0 : index
    %c0_18 = arith.constant 0 : index
    %25 = vector.load %arg7[%c0_16, %c0_17, %c0_18] : memref<2x8x16xf32, #tpu.memory_space<vmem>>, vector<1x8x16xf32>
    %26 = vector.shape_cast %25 : vector<1x8x16xf32> to vector<8x16xf32>
    %cst_19 = arith.constant dense<0.000000e+00> : vector<8x64xf32>
    %27 = tpu.matmul %26, %24, %cst_19 {dimension_numbers = #tpu.dot_dimension_numbers<[1], [0], [0], [1], [0, 0, 1, 1], [], []>} : vector<8x16xf32>, vector<16x64xf32>, vector<8x64xf32> -> vector<8x64xf32>
    %28 = arith.addf %7, %27 : vector<8x64xf32>
    %29 = vector.extract_strided_slice %6 {offsets = [16, 0], sizes = [16, 64], strides = [1, 1]} : vector<32x64xf32> to vector<16x64xf32>
    %c1 = arith.constant 1 : index
    %c0_20 = arith.constant 0 : index
    %c0_21 = arith.constant 0 : index
    %30 = vector.load %arg10[%c1, %c0_20, %c0_21] : memref<2x4x16xf32, #tpu.memory_space<vmem>>, vector<1x4x16xf32>
    %31 = vector.shape_cast %30 : vector<1x4x16xf32> to vector<4x16xf32>
    %c1_22 = arith.constant 1 : index
    %c0_23 = arith.constant 0 : index
    %c0_24 = arith.constant 0 : index
    %32 = vector.load %arg11[%c1_22, %c0_23, %c0_24] : memref<2x16x4xf32, #tpu.memory_space<vmem>>, vector<1x16x4xf32>
    %33 = vector.shape_cast %32 : vector<1x16x4xf32> to vector<16x4xf32>
    %cst_25 = arith.constant dense<0.000000e+00> : vector<4x64xf32>
    %34 = tpu.matmul %31, %29, %cst_25 {dimension_numbers = #tpu.dot_dimension_numbers<[1], [0], [0], [1], [0, 0, 1, 1], [], []>} : vector<4x16xf32>, vector<16x64xf32>, vector<4x64xf32> -> vector<4x64xf32>
    %cst_26 = arith.constant dense<0xFF800000> : vector<64xf32>
    %35 = vector.multi_reduction <maximumf>, %34, %cst_26 [0] : vector<4x64xf32> to vector<64xf32>
    %36 = vector.shape_cast %35 : vector<64xf32> to vector<1x64xf32>
    %37 = vector.broadcast %36 : vector<1x64xf32> to vector<4x64xf32>
    %38 = arith.subf %34, %37 : vector<4x64xf32>
    %39 = math.exp %38 : vector<4x64xf32>
    %cst_27 = arith.constant dense<0.000000e+00> : vector<64xf32>
    %40 = vector.multi_reduction <add>, %39, %cst_27 [0] : vector<4x64xf32> to vector<64xf32>
    %41 = vector.shape_cast %40 : vector<64xf32> to vector<1x64xf32>
    %cst_28 = arith.constant dense<0.000000e+00> : vector<16x64xf32>
    %42 = tpu.matmul %33, %39, %cst_28 {dimension_numbers = #tpu.dot_dimension_numbers<[1], [0], [0], [1], [0, 0, 1, 1], [], []>} : vector<16x4xf32>, vector<4x64xf32>, vector<16x64xf32> -> vector<16x64xf32>
    %43 = tpu.reciprocal %41 {approx = true} : vector<1x64xf32> -> vector<1x64xf32>
    %44 = vector.broadcast %43 : vector<1x64xf32> to vector<16x64xf32>
    %45 = arith.mulf %42, %44 : vector<16x64xf32>
    %c1_29 = arith.constant 1 : index
    %c0_30 = arith.constant 0 : index
    %c0_31 = arith.constant 0 : index
    %46 = vector.load %arg7[%c1_29, %c0_30, %c0_31] : memref<2x8x16xf32, #tpu.memory_space<vmem>>, vector<1x8x16xf32>
    %47 = vector.shape_cast %46 : vector<1x8x16xf32> to vector<8x16xf32>
    %cst_32 = arith.constant dense<0.000000e+00> : vector<8x64xf32>
    %48 = tpu.matmul %47, %45, %cst_32 {dimension_numbers = #tpu.dot_dimension_numbers<[1], [0], [0], [1], [0, 0, 1, 1], [], []>} : vector<8x16xf32>, vector<16x64xf32>, vector<8x64xf32> -> vector<8x64xf32>
    %49 = arith.addf %28, %48 : vector<8x64xf32>
    %c0_33 = arith.constant 0 : index
    %c0_34 = arith.constant 0 : index
    %50 = vector.load %arg8[%c0_33, %c0_34] : memref<8x1xf32, #tpu.memory_space<vmem>>, vector<8x1xf32>
    %51 = vector.broadcast %50 : vector<8x1xf32> to vector<8x64xf32>
    %52 = arith.addf %49, %51 : vector<8x64xf32>
    %c0_35 = arith.constant 0 : index
    %c0_36 = arith.constant 0 : index
    %c0_37 = arith.constant 0 : index
    %53 = vector.load %arg9[%c0_35, %c0_36, %c0_37] : memref<1x8x64xf32, #tpu.memory_space<vmem>>, vector<1x8x64xf32>
    %54 = vector.shape_cast %53 : vector<1x8x64xf32> to vector<8x64xf32>
    %55 = vector.shape_cast %52 : vector<8x64xf32> to vector<1x8x64xf32>
    tpu.vector_store %arg9[%c0_35, %c0_36, %c0_37], %55 {strides = array<i32>} : memref<1x8x64xf32, #tpu.memory_space<vmem>>, vector<1x8x64xf32>,
    return
  }
  func.func @transform_0(%arg0: i32, %arg1: i32) -> (i32, i32, i32) {
    %c0_i32 = arith.constant 0 : i32
    %c0_i32_0 = arith.constant 0 : i32
    return %arg0, %c0_i32, %arg1 : i32, i32, i32
  }
  func.func @transform_1(%arg0: i32, %arg1: i32) -> (i32, i32, i32) {
    %c0_i32 = arith.constant 0 : i32
    %c0_i32_0 = arith.constant 0 : i32
    %c0_i32_1 = arith.constant 0 : i32
    return %arg0, %c0_i32, %c0_i32_0 : i32, i32, i32
  }
  func.func @transform_2(%arg0: i32, %arg1: i32) -> (i32, i32) {
    %c0_i32 = arith.constant 0 : i32
    %c0_i32_0 = arith.constant 0 : i32
    %c0_i32_1 = arith.constant 0 : i32
    return %c0_i32, %c0_i32_0 : i32, i32
  }
  func.func @transform_3(%arg0: i32, %arg1: i32) -> (i32, i32, i32) {
    %c0_i32 = arith.constant 0 : i32
    %c0_i32_0 = arith.constant 0 : i32
    %c0_i32_1 = arith.constant 0 : i32
    %c0_i32_2 = arith.constant 0 : i32
    return %c0_i32, %c0_i32_0, %c0_i32_1 : i32, i32, i32
  }
  func.func @transform_4(%arg0: i32, %arg1: i32) -> (i32, i32, i32) {
    %c0_i32 = arith.constant 0 : i32
    %c0_i32_0 = arith.constant 0 : i32
    %c0_i32_1 = arith.constant 0 : i32
    %c0_i32_2 = arith.constant 0 : i32
    return %c0_i32, %c0_i32_0, %c0_i32_1 : i32, i32, i32
  }
  func.func @transform_5(%arg0: i32, %arg1: i32) -> (i32, i32, i32) {
    %c0_i32 = arith.constant 0 : i32
    %c0_i32_0 = arith.constant 0 : i32
    %c0_i32_1 = arith.constant 0 : i32
    %c0_i32_2 = arith.constant 0 : i32
    return %c0_i32, %c0_i32_0, %c0_i32_1 : i32, i32, i32
  }
  func.func @transform_6(%arg0: i32, %arg1: i32) -> (i32, i32) {
    %c0_i32 = arith.constant 0 : i32
    %c0_i32_0 = arith.constant 0 : i32
    %c0_i32_1 = arith.constant 0 : i32
    return %c0_i32, %c0_i32_0 : i32, i32
  }
  func.func @transform_7(%arg0: i32, %arg1: i32) -> (i32, i32, i32) {
    %c0_i32 = arith.constant 0 : i32
    %c0_i32_0 = arith.constant 0 : i32
    return %arg0, %c0_i32, %arg1 : i32, i32, i32
  }
}

</mosaic_0001>

<bundles_post_ra>
// kernel: tpu_custom_call.1
= control target key start
LH: loop header
LB: loop body
LE: loop exit
PB: predicated region body
PF: predicated region fallthrough
CT: control target
= control target key end

     0   :  { %12 = vsyncpa [#allocation5], 0  ;;  %s2122_s0 = inlined_call_operand.vmem [shape: f32[2,8,64], index: 0, kind: input, shape index: {}]   ;;  %s2123_s1 = inlined_call_operand.vmem [shape: f32[2,4,128], index: 1, kind: input, shape index: {}]   ;;  %s2124_s2 = inlined_call_operand.vmem [shape: f32[32,8], index: 2, kind: input, shape index: {}]   ;;  %s2125_s3 = inlined_call_operand.vmem [shape: f32[2,128,16], index: 3, kind: input, shape index: {}]   ;;  %s2126_s4 = inlined_call_operand.vmem [shape: f32[2,16,128], index: 4, kind: input, shape index: {}]   ;;  %s2127_s5 = inlined_call_operand.vmem [shape: f32[2,8,16], index: 5, kind: input, shape index: {}]   ;;  %s2128_s6 = inlined_call_operand.vmem [shape: f32[8,1], index: 6, kind: input, shape index: {}]   ;;  %s2129_s7 = inlined_call_operand.hbm [shape: f32[2,8,64], index: 7, kind: output, shape index: {}]  }
   0x1   :  { %14 = vsyncpa [#allocation5 + $0x1], 0  ;;  %s1807_s24 = smov 0   ;;  %s1809_s25 = smov 0  }
   0x2   :  { %s1811_s26 = smov 0   ;;  %s1813_s27 = smov 0  }
   0x3   :  { %s1815_s28 = smov 0   ;;  %s1817_s29 = smov 0  }
   0x4 LB: > { %s1384_s30 = sadd.s32 4294967295, %s1761_s29   ;;  %s1385_s8 = sadd.s32 4294967294, %s1761_s29   ;;  %s1761_s29 = sphi %s1817_s29, %s20_s29   ;;  %s1757_s28 = sphi %s1815_s28, %s2136_s28   ;;  %s1753_s27 = sphi %s1813_s27, %s2135_s27   ;;  %s1749_s26 = sphi %s1811_s26, %s2134_s26   ;;  %s1745_s25 = sphi %s1809_s25, %s2133_s25   ;;  %s1741_s24 = sphi %s1807_s24, %s2132_s24  }
   0x5   : > { %s32_s9 = sadd.s32 1, %s1757_s28  ;;  %s200_s10 = sadd.s32 1, %s1749_s26 }
   0x6   : > { %p34_p0 = scmp.ge.s32.totalorder %s32_s9, 2  ;;  %p210_p1 = scmp.ne.s32.totalorder %s1749_s26, %s1745_s25 }
   0x7   : > { %p211_p2 = scmp.eq.s32.totalorder %s1384_s30, 1  ;;  %p216_p3 = scmp.ne.s32.totalorder %s1745_s25, %s1741_s24 }
   0x8   : > { %s2138_s9 = smov (%p34_p0, %s32_s9), 0  ;;  %p217_p5 = scmp.eq.s32.totalorder %s1385_s8, 1 }
   0x9   : > { %p1847_p4 = por %p211_p2, %p210_p1  ;;  %s195_s12 = ssub.s32 %s1757_s28, %s2138_s9 }
   0xa   : > { %p1388_p6 = scmp.ge.s32.totalorder %s1761_s29, 1  ;;  %p198_p7 = scmp.eq.s32.totalorder %s195_s12, 0 }
   0xb   : > { %p1854_p8 = por %p217_p5, %p216_p3  ;;  %p267_p9 = scmp.lt.s32.totalorder %s1761_s29, 3 }
   0xc   : > { %s1860_s14 = scalar_select %p198_p7, %s1749_s26, %s200_s10  }
   0xd   : > { %p268_p10 = pnand %p1388_p6, %p267_p9 }
   0xe   : > { %p305_p11 = scmp.lt.s32.totalorder (!%p268_p10), %s1753_s27, 1  ;;  %s302_s23 = sand.u32 (!%p268_p10), 1, %s1745_s25  }
   0xf   : > { %271 = sbr.rel (%p268_p10) target bundleno = 897 (0x381), region = 48  ;;  %s1426_s8 = sshll.u32 (!%p268_p10), %s1753_s27, 7 }
  0x10   : > { %s1299_s17 = scalar_lea.hbm (!%p268_p10), %s2129_s7, %s1426_s8  ;;  %s1287_s18 = scalar_lea.sflag (!%p268_p10), [#allocation5], %s302_s23 }
  0x11   : > { %s1766_s19 = smov (!%p268_p10), [#allocation4]  }
  0x14   : > { %v336_v0 = vld [vmem:[%s2125_s3 + $0x78] sm:$0xff]  ;;  %v1763_v1 = vmov 0.0   ;;  %v335_v2 = vld [vmem:[%s2125_s3 + $0x70] sm:$0xff]  ;;  %v409_v3 = vld [vmem:[%s2126_s4] sm:$0xff]  ;;  %vm1764_vm0 = vmmov 0   ;;  %s1876_s21 = scalar_select %p305_p11, %s1753_s27, 1 }
  0x15   : > { %1492 = vmatprep.subr.mxu0 %v1763_v1  ;;  %1524 = vmatprep.mubr.msk.f32.mxu0 %vm1764_vm0, %v1763_v1  ;;  %v334_v4 = vld [vmem:[%s2125_s3 + $0x68] sm:$0xff]  ;;  %v333_v5 = vld [vmem:[%s2125_s3 + $0x60] sm:$0xff]  ;;  %v332_v7 = vld [vmem:[%s2125_s3 + $0x58] sm:$0xff]  ;;  %vm664_vm1 = vcmask 64512   ;;  %vm486_vm2 = vcmask 31744   ;;  %vm407_vm3 = vcmask 125952  }
  0x16   : > { %1493 = vmatpush3.msra.mxu0 %v336_v0  ;;  %1529 = vmatprep.mubr.f32.mxu1 %v409_v3  ;;  %s1391_s30 = sshll.u32 %s1876_s21, 2  ;;  %v410_v8 = vld [vmem:[%s2126_s4 + $0x8] sm:$0xff]  ;;  %v331_v9 = vld [vmem:[%s2125_s3 + $0x50] sm:$0xff]  ;;  %v1407_v10 = vld [vmem:[%s2125_s3 + $0xf8] sm:$0xff]  ;;  %s1390_s10 = sshll.u32 %s1876_s21, 3  ;;  %vm765_vm4 = vcmask 130048  }
  0x17   : > { %1494 = vmatprep.subr.mxu0 %v1763_v1  ;;  %s315_s12 = scalar_lea.vmem %s2123_s1, %s1391_s30  ;;  %v330_v11 = vld [vmem:[%s2125_s3 + $0x48] sm:$0xff]  ;;  %v1406_v12 = vld [vmem:[%s2125_s3 + $0xf0] sm:$0xff]  ;;  %v329_v13 = vld [vmem:[%s2125_s3 + $0x40] sm:$0xff]  ;;  %s311_s22 = scalar_lea.vmem %s2122_s0, %s1390_s10  ;;  %vm839_vm5 = vcmask 519168   ;;  %vm864_vm6 = vcmask 1043456   ;;  %vm1284_vm7 = vcmask 523264  }
  0x18   : > { %1495 = vmatpush3.msra.mxu0 %v335_v2  ;;  %v1890_v6 = vld [vmem:[%s315_s12] sm:$0xf]  ;;  %v1405_v14 = vld [vmem:[%s2125_s3 + $0xe8] sm:$0xff]  ;;  %v328_v15 = vld [vmem:[%s2125_s3 + $0x38] sm:$0xff]  ;;  %s1389_s30 = sshll.u32 %s302_s23, 3  ;;  %s1689_s27 = sshll.u32 %s1766_s19, 4  ;;  %s1690_s27 = int_to_ptr.vmem [resolvable:$false] %s1689_s27 }
  0x19   : > { %1496 = vmatprep.subr.mxu0 %v1763_v1  ;;  %1527 = vmatprep.subr.mxu1 %v1890_v6  ;;  %v1404_v16 = vld [vmem:[%s2125_s3 + $0xe0] sm:$0xff]  ;;  %v327_v17 = vld [vmem:[%s2125_s3 + $0x30] sm:$0xff]  ;;  %v1403_v18 = vld [vmem:[%s2125_s3 + $0xd8] sm:$0xff]  ;;  %s304_s12 = scalar_lea.vmem [#allocation4], %s1389_s30  ;;  %s1691_s20 = scalar_lea.vmem %s1690_s27, 256 }
  0x1a   : > { %1497 = vmatpush3.msra.mxu0 %v334_v4  ;;  %1528 = vmatpush3.xpose.msra.mxu1 %v1890_v6  ;;  %v326_v19 = vld [vmem:[%s2125_s3 + $0x28] sm:$0xff]  ;;  %v1402_v20 = vld [vmem:[%s2125_s3 + $0xd0] sm:$0xff]  ;;  %v325_v21 = vld [vmem:[%s2125_s3 + $0x20] sm:$0xff]  ;;  %s1301_s10 = sshll.u32 %s304_s12, 4  ;;  %s1302_s10 = int_to_ptr.vmem [resolvable:$true] %s1301_s10 }
  0x1b   : > { %1498 = vmatprep.subr.mxu0 %v1763_v1  ;;  %1532 = vmatprep.subr.mxu1 %v1763_v1  ;;  %v1401_v22 = vld [vmem:[%s2125_s3 + $0xc8] sm:$0xff]  ;;  %v324_v23 = vld [vmem:[%s2125_s3 + $0x18] sm:$0xff]  ;;  %v1400_v24 = vld [vmem:[%s2125_s3 + $0xc0] sm:$0xff]  ;;  %s1685_s21 = scalar_lea.vmem %s1302_s10, 128  ;;  %p1692_p1 = scmp.lt.s32.totalorder %s1302_s10, %s1690_s27 }
  0x1c   : > { %1499 = vmatpush3.msra.mxu0 %v333_v5  ;;  %v323_v25 = vld [vmem:[%s2125_s3 + $0x10] sm:$0xff]  ;;  %v1399_v26 = vld [vmem:[%s2125_s3 + $0xb8] sm:$0xff]  ;;  %v322_v27 = vld [vmem:[%s2125_s3 + $0x8] sm:$0xff]  ;;  %p1686_p12 = scmp.ne.s32.totalorder %s1302_s10, %s1685_s21  ;;  %p1693_p2 = scmp.lt.s32.totalorder %s1691_s20, %s1685_s21 }
  0x1d   : > { %1500 = vmatprep.subr.mxu0 %v1763_v1  ;;  %1530 = vmatmul.mubr.f32.vlgmr.msra.gmra.mxu1 %v410_v8  ;;  %v1398_v28 = vld [vmem:[%s2125_s3 + $0xb0] sm:$0xff]  ;;  %v321_v29 = vld [vmem:[%s2125_s3] sm:$0xff]  ;;  %v1397_v30 = vld [vmem:[%s2125_s3 + $0xa8] sm:$0xff] }
  0x1e   : > { %1501 = vmatpush3.msra.mxu0 %v332_v7  ;;  %1533 = vmatpush3.msra.mxu1 %v1407_v10  ;;  %v1396_v31 = vld [vmem:[%s2125_s3 + $0xa0] sm:$0xff]  ;;  %v1395_v32 = vld [vmem:[%s2125_s3 + $0x98] sm:$0xff]  ;;  %v1408_v33 = vld [vmem:[%s2126_s4 + $0x10] sm:$0xff]  ;;  %p1687_p13 = pnand %p1686_p12, %p1847_p4  ;;  %p1694_p3 = por %p1693_p2, %p1692_p1 }
  0x1f   : > { %1502 = vmatprep.subr.mxu0 %v1763_v1  ;;  %1534 = vmatprep.subr.mxu1 %v1763_v1  ;;  %v663_v34 = vld [vmem:[%s311_s22] sm:$0xff]  ;;  %v1409_v35 = vld [vmem:[%s2126_s4 + $0x18] sm:$0xff]  ;;  %v1394_v36 = vld [vmem:[%s2125_s3 + $0x90] sm:$0xff] }
  0x20   : > { %1503 = vmatpush3.msra.mxu0 %v331_v9  ;;  %1535 = vmatpush3.msra.mxu1 %v1406_v12  ;;  %v1393_v37 = vld [vmem:[%s2125_s3 + $0x88] sm:$0xff]  ;;  %v659_v38 = vld [vmem:[%s2124_s2] sm:$0xff]  ;;  %v661_v41 = vld [vmem:[%s2124_s2 + $0x10] sm:$0xff]  ;;  %p1688_p0 = pneg %p1687_p13 }
  0x21   : > { %1504 = vmatprep.subr.mxu0 %v1763_v1  ;;  %1536 = vmatprep.subr.mxu1 %v1763_v1  ;;  %v660_v39 = vld [vmem:[%s2124_s2 + $0x8] sm:$0xff]  ;;  %v1392_v40 = vld [vmem:[%s2125_s3 + $0x80] sm:$0xff]  ;;  %v662_v42 = vld [vmem:[%s2124_s2 + $0x18] sm:$0xff] }
  0x22   : > { %1505 = vmatpush3.msra.mxu0 %v330_v11  ;;  %1537 = vmatpush3.msra.mxu1 %v1405_v14  ;;  %p1695_p5 = pnand %p1694_p3, %p1688_p0 }
  0x23   : > { %1506 = vmatprep.subr.mxu0 %v1763_v1  ;;  %1538 = vmatprep.subr.mxu1 %v1763_v1 }
  0x24   : > { %1507 = vmatpush3.msra.mxu0 %v329_v13  ;;  %1539 = vmatpush3.msra.mxu1 %v1404_v16 }
  0x25   : > { %1508 = vmatprep.subr.mxu0 %v1763_v1  ;;  %1540 = vmatprep.subr.mxu1 %v1763_v1 }
  0x26   : > { %1509 = vmatpush3.msra.mxu0 %v328_v15  ;;  %1541 = vmatpush3.msra.mxu1 %v1403_v18 }
  0x27   : > { %1510 = vmatprep.subr.mxu0 %v1763_v1  ;;  %1542 = vmatprep.subr.mxu1 %v1763_v1 }
  0x28   : > { %1511 = vmatpush3.msra.mxu0 %v327_v17  ;;  %1543 = vmatpush3.msra.mxu1 %v1402_v20 }
  0x29   : > { %1512 = vmatprep.subr.mxu0 %v1763_v1  ;;  %1544 = vmatprep.subr.mxu1 %v1763_v1 }
  0x2a   : > { %1513 = vmatpush3.msra.mxu0 %v326_v19  ;;  %1545 = vmatpush3.msra.mxu1 %v1401_v22 }
  0x2b   : > { %1514 = vmatprep.subr.mxu0 %v1763_v1  ;;  %1546 = vmatprep.subr.mxu1 %v1763_v1 }
  0x2c   : > { %1515 = vmatpush3.msra.mxu0 %v325_v21  ;;  %1547 = vmatpush3.msra.mxu1 %v1400_v24  ;;  %v1277_v24 = vld [vmem:[%s2128_s6] sm:$0xff] }
  0x2d   : > { %1516 = vmatprep.subr.mxu0 %v1763_v1  ;;  %1548 = vmatprep.subr.mxu1 %v1763_v1 }
  0x2e   : > { %1517 = vmatpush3.msra.mxu0 %v324_v23  ;;  %1549 = vmatpush3.msra.mxu1 %v1399_v26 }
  0x2f   : > { %1518 = vmatprep.subr.mxu0 %v1763_v1  ;;  %1550 = vmatprep.subr.mxu1 %v1763_v1 }
  0x30   : > { %1519 = vmatpush3.msra.mxu0 %v323_v25  ;;  %1551 = vmatpush3.msra.mxu1 %v1398_v28  ;;  %v1765_v25 = vmov 0  }
  0x31   : > { %1520 = vmatprep.subr.mxu0 %v1763_v1  ;;  %1552 = vmatprep.subr.mxu1 %v1763_v1 }
  0x32   : > { %1521 = vmatpush3.msra.mxu0 %v322_v27  ;;  %1553 = vmatpush3.msra.mxu1 %v1397_v30 }
  0x33   : > { %1522 = vmatprep.subr.mxu0 %v1763_v1  ;;  %1554 = vmatprep.subr.mxu1 %v1763_v1 }
  0x34   : > { %1523 = vmatpush3.msra.mxu0 %v321_v29  ;;  %1555 = vmatpush3.msra.mxu1 %v1396_v31 }
  0x35   : > { %1525 = vmatmul.mubr.f32.vlgmr.msra.gmra.mxu0 %v1890_v6  ;;  %1567 = vmatprep.subr.mxu0 %v1890_v6 }
  0x36   : > { %1568 = vmatpush3.xpose.msra.mxu0 %v1890_v6  ;;  %1556 = vmatprep.subr.mxu1 %v1763_v1 }
  0x37   : > { %1557 = vmatpush3.msra.mxu1 %v1395_v32  ;;  %1569 = vmatprep.mubr.f32.mxu0 %v1408_v33 }
  0x38   : > { %1558 = vmatprep.subr.mxu1 %v1763_v1  ;;  %1572 = vmatprep.subr.mxu0 %v663_v34 }
  0x39   : > { %1570 = vmatmul.mubr.f32.vlgmr.msra.gmra.mxu0 %v1409_v35  ;;  %1559 = vmatpush3.msra.mxu1 %v1394_v36 }
  0x3a   : > { %1560 = vmatprep.subr.mxu1 %v1763_v1  ;;  %1573 = vmatpush3.msra.mxu0 %v663_v34 }
  0x3b   : > { %1561 = vmatpush3.msra.mxu1 %v1393_v37  ;;  %1574 = vmatprep.mubr.msk.f32.mxu0 %vm664_vm1, %v659_v38 }
  0x3c   : > { %1562 = vmatprep.subr.mxu1 %v1763_v1  ;;  %1564 = vmatprep.mubr.msk.f32.mxu1 %vm1764_vm0, %v1763_v1 }
  0x3d   : > { %1575 = vmatmul.mubr.msk.f32.vlgmr.msra.gmra.mxu0 %vm664_vm1, %v660_v39  ;;  %1563 = vmatpush3.msra.mxu1 %v1392_v40 }
  0x3e   : > { %1565 = vmatmul.mubr.f32.vlgmr.msra.gmra.mxu1 %v1890_v6  ;;  %1577 = vmatprep.mubr.msk.f32.mxu0 %vm664_vm1, %v661_v41 }
  0x3f   : > { %1580 = vmatprep.subr.mxu1 %v1763_v1  ;;  %1584 = vmatprep.mubr.msk.f32.mxu1 %vm1764_vm0, %v1763_v1 }
  0x40   : > { %1592 = vmatprep.subr.mxu0 %v1763_v1  ;;  %1676 = vset.pattern.permute.xlu0 %v1765_v25 }
  0x41   : > { %1578 = vmatmul.mubr.msk.f32.gmra.mxu0 %vm664_vm1, %v662_v42  ;;  %1280 = vperm.xlu0 %1676, %v1277_v24  }
  0x42   : > { %1596 = vmatprep.mubr.msk.f32.mxu0 %vm1764_vm0, %v1763_v1 }
  0xdd   : > { %v1531_v43 = vpop.f32.mrf.mxu1 }
  0xde   : > { %488 = vst.msk [vmem:[#allocation3 + $0x8] sm:$0xff] %vm486_vm2, %v1531_v43  ;;  %v946_v43 = vld [vmem:[%s2127_s5] sm:$0xff] }
  0xdf   : > { %v477_v44 = vpop.f32.mrf.mxu1 }
  0xe0   : > { %487 = vst.msk [vmem:[#allocation3] sm:$0xff] %vm486_vm2, %v477_v44 }
  0xe5   : > { %v764_v19 = vld [vmem:[#allocation3 + $0x8] sm:$0xff] }
  0xe7   : > { %v763_v55 = vld [vmem:[#allocation3] sm:$0xff] }
  0xf5   : > { %v403_v45 = vpop.f32.mrf.mxu0 }
  0xf6   : > { %408 = vst.msk [vmem:[#allocation2] sm:$0xf] %vm407_vm3, %v403_v45 }
  0xf7   : > { %v1526_v46 = vpop.f32.mrf.mxu0 }
  0xf9   : > { %v1571_v47 = vpop.f32.mrf.mxu0 }
  0xfa   : > { %658 = vst.msk [vmem:[#allocation3 + $0x18] sm:$0xff] %vm486_vm2, %v1571_v47 }
  0xfb   : > { %v647_v48 = vpop.f32.mrf.mxu0 }
  0xfc   : > { %657 = vst.msk [vmem:[#allocation3 + $0x10] sm:$0xff] %vm486_vm2, %v647_v48 }
  0xfd   : > { %v1576_v49 = vpop.f32.mrf.mxu0  ;;  %v762_v51 = vld [vmem:[#allocation2] sm:$0xf] }
  0xfe   : > { %1581 = vmatpush3.msra.mxu1 %v1576_v49  ;;  %v572_v50 = vpop.f32.mrf.mxu1  ;;  %v1422_v49 = vld [vmem:[%s2127_s5 + $0x8] sm:$0xff] }
  0xff   : > { %577 = vst.msk [vmem:[#allocation2 + $0x4] sm:$0xf] %vm407_vm3, %v572_v50  ;;  %v743_v52 = vpop.f32.mrf.mxu0  ;;  %1582 = vmatprep.subr.mxu1 %v1763_v1 }
 0x100   : > { %1583 = vmatpush3.msra.mxu1 %v743_v52  ;;  %v1566_v53 = vpop.f32.mrf.mxu1 }
 0x101   : > { %v1579_v54 = vpop.f32.mrf.mxu0  ;;  %1585 = vmatmul.mubr.msk.f32.vlgmr.msra.gmra.mxu1 %vm765_vm4, %v762_v51  ;;  %v951_v23 = vld [vmem:[#allocation3 + $0x18] sm:$0xff]  ;;  %v1281_v53 = vpop.permute.xlu0 %1280 }
 0x102   : > { %1589 = vmatprep.mubr.msk.f32.mxu1 %vm486_vm2, %v763_v55  ;;  %1593 = vmatpush3.msra.mxu0 %v1579_v54 }
 0x103   : > { %v753_v56 = vpop.f32.mrf.mxu0  ;;  %1594 = vmatprep.subr.mxu0 %v1763_v1  ;;  %v950_v20 = vld [vmem:[#allocation3 + $0x10] sm:$0xff] }
 0x104   : > { %1595 = vmatpush3.msra.mxu0 %v753_v56 }
 0x105   : > { %1604 = vmatprep.subr.mxu0 %v1763_v1 }
 0x106   : > { %v948_v57 = vld [vmem:[#allocation2 + $0x4] sm:$0xf] }
 0x107   : > { %1597 = vmatmul.mubr.msk.f32.vlgmr.msra.gmra.mxu0 %vm765_vm4, %v948_v57 }
 0x108   : > { %1608 = vmatprep.mubr.msk.f32.mxu0 %vm1764_vm0, %v1763_v1 }
 0x1c1   : > { %v835_v58 = vpop.f32.mrf.mxu1 }
 0x1c2   : > { %v840_v59 = vsel %vm839_vm5, %v835_v58, -inf }
 0x1c3   : > { %v841_v60 = vrot.slane %v840_v59, 4  ;;  %v1586_v61 = vpop.f32.mrf.mxu1 }
 0x1c5   : > { %v842_v62 = vmax.f32 %v840_v59, %v841_v60 }
 0x1c7   : > { %v843_v63 = vrot.slane %v842_v62, 2  ;;  %v1021_v0 = vpop.f32.mrf.mxu0 }
 0x1c8   : > { %v1025_v2 = vsel %vm839_vm5, %v1021_v0, -inf }
 0x1c9   : > { %v844_v3 = vmax.f32 %v842_v62, %v843_v63  ;;  %v1026_v4 = vrot.slane %v1025_v2, 4  ;;  %v1598_v5 = vpop.f32.mrf.mxu0 }
 0x1cb   : > { %v845_v6 = vrot.slane %v844_v3, 1  ;;  %v1027_v7 = vmax.f32 %v1025_v2, %v1026_v4 }
 0x1cd   : > { %v846_v8 = vmax.f32 %v844_v3, %v845_v6  ;;  %v1028_v9 = vrot.slane %v1027_v7, 2 }
 0x1cf   : > { %v847_v10 = vsub.f32 %v835_v58, %v846_v8  ;;  %v1029_v11 = vmax.f32 %v1027_v7, %v1028_v9 }
 0x1d1   : > { %v848_v12 = vmul.f32 1.442695, %v847_v10  ;;  %v1030_v13 = vrot.slane %v1029_v11, 1 }
 0x1d3   : > { %1677 = vpow2.f32 %v848_v12  ;;  %v1031_v14 = vmax.f32 %v1029_v11, %v1030_v13 }
 0x1d5   : > { %v1032_v15 = vsub.f32 %v1021_v0, %v1031_v14 }
 0x1d7   : > { %v1033_v16 = vmul.f32 1.442695, %v1032_v15 }
 0x1d9   : > { %1679 = vpow2.f32 %v1033_v16 }
 0x1e0   : > { %v1678_v17 = vpop.eup %1677 }
 0x1e1   : > { %v850_v18 = vsel %vm839_vm5, %v1678_v17, 0.0  ;;  %1587 = vmatprep.subr.msk.mxu1 %vm864_vm6, %v1678_v17 }
 0x1e2   : > { %1588 = vmatpush3.msk.msra.mxu1 %vm864_vm6, %v1678_v17  ;;  %v851_v26 = vrot.slane %v850_v18, 4 }
 0x1e3   : > { %1590 = vmatmul.mubr.msk.f32.vlgmr.msra.gmra.mxu1 %vm486_vm2, %v764_v19 }
 0x1e4   : > { %1601 = vmatprep.mubr.msk.f32.mxu1 %vm486_vm2, %v950_v20  ;;  %v852_v27 = vadd.f32 %v851_v26, %v850_v18 }
 0x1e6   : > { %v1680_v21 = vpop.eup %1679  ;;  %v853_v29 = vrot.slane %v852_v27, 2 }
 0x1e7   : > { %1599 = vmatprep.subr.msk.mxu1 %vm864_vm6, %v1680_v21  ;;  %v1035_v22 = vsel %vm839_vm5, %v1680_v21, 0.0 }
 0x1e8   : > { %1600 = vmatpush3.msk.msra.mxu1 %vm864_vm6, %v1680_v21  ;;  %v1036_v28 = vrot.slane %v1035_v22, 4  ;;  %v854_v31 = vadd.f32 %v853_v29, %v852_v27 }
 0x1e9   : > { %1602 = vmatmul.mubr.msk.f32.vlgmr.msra.gmra.mxu1 %vm486_vm2, %v951_v23  ;;  %1611 = vmatprep.subr.mxu1 %v1763_v1 }
 0x1ea   : > { %1615 = vmatprep.mubr.msk.f32.mxu1 %vm1764_vm0, %v1763_v1  ;;  %v1037_v30 = vadd.f32 %v1036_v28, %v1035_v22  ;;  %v855_v33 = vrot.slane %v854_v31, 1 }
 0x1ec   : > { %v1038_v32 = vrot.slane %v1037_v30, 2  ;;  %v856_v35 = vadd.f32 %v855_v33, %v854_v31 }
 0x1ee   : > { %v1039_v34 = vadd.f32 %v1038_v32, %v1037_v30  ;;  %1681 = vrcp.f32 %v856_v35 }
 0x1f0   : > { %v1040_v36 = vrot.slane %v1039_v34, 1 }
 0x1f2   : > { %v1041_v37 = vadd.f32 %v1040_v36, %v1039_v34 }
 0x1f4   : > { %1683 = vrcp.f32 %v1041_v37 }
 0x1fb   : > { %v1682_v38 = vpop.eup %1681 }
 0x201   : > { %v1684_v44 = vpop.eup %1683 }
 0x2a3   : > { %v1591_v39 = vpop.f32.mrf.mxu1 }
 0x2a4   : > { %v945_v40 = vmul.f32 %v1682_v38, %v1591_v39 }
 0x2a5   : > { %v934_v41 = vpop.f32.mrf.mxu1 }
 0x2a6   : > { %v944_v42 = vmul.f32 %v1682_v38, %v934_v41  ;;  %1612 = vmatpush3.msra.mxu1 %v945_v40 }
 0x2a7   : > { %1613 = vmatprep.subr.mxu1 %v1763_v1 }
 0x2a8   : > { %1614 = vmatpush3.msra.mxu1 %v944_v42 }
 0x2a9   : > { %v1603_v45 = vpop.f32.mrf.mxu1  ;;  %1616 = vmatmul.mubr.msk.f32.vlgmr.msra.gmra.mxu1 %vm765_vm4, %v946_v43 }
 0x2aa   : > { %v1128_v46 = vmul.f32 %v1684_v44, %v1603_v45 }
 0x2ab   : > { %v1117_v47 = vpop.f32.mrf.mxu1 }
 0x2ac   : > { %v1127_v48 = vmul.f32 %v1684_v44, %v1117_v47  ;;  %1605 = vmatpush3.msra.mxu0 %v1128_v46 }
 0x2ad   : > { %1606 = vmatprep.subr.mxu0 %v1763_v1 }
 0x2ae   : > { %1607 = vmatpush3.msra.mxu0 %v1127_v48 }
 0x2af   : > { %1609 = vmatmul.mubr.msk.f32.vlgmr.msra.gmra.mxu0 %vm765_vm4, %v1422_v49 }
 0x369   : > { %v1273_v50 = vpop.f32.mrf.mxu1 }
 0x36b   : > { %v1617_v51 = vpop.f32.mrf.mxu1 }
 0x36f   : > { %v1200_v52 = vpop.f32.mrf.mxu0 }
 0x370   : > { %v1274_v54 = vadd.f32 %v1273_v50, %v1200_v52 }
 0x371   : > { %v1610_v55 = vpop.f32.mrf.mxu0 }
 0x372   : > { %v1283_v56 = vadd.f32 %v1281_v53, %v1274_v54 }
 0x374   : > { %1285 = vst.msk [vmem:[%s304_s12] sm:$0xff] %vm1284_vm7, %v1283_v56 }
 0x375   : > { %1698 = shalt.err (!%p1695_p5)
}
 0x376   : > { %s1699_s22 = scalar_lea.hbm %s1299_s17, 128  ;;  %s1703_s8 = scalar_lea.hbm %s2129_s7, 256 }
 0x377   : > { %p1700_p6 = scmp.ne.s32.totalorder %s1299_s17, %s1699_s22  ;;  %p1704_p10 = scmp.lt.s32.totalorder %s1299_s17, %s2129_s7 }
 0x378   : > { %p1705_p11 = scmp.lt.s32.totalorder %s1703_s8, %s1699_s22 }
 0x379   : > { %p1701_p7 = pnand %p1700_p6, %p1847_p4 }
 0x37a   : > { %p1706_p12 = por %p1705_p11, %p1704_p10 }
 0x37b   : > { %p1702_p9 = pneg %p1701_p7 }
 0x37d   : > { %p1707_p13 = pnand %p1706_p12, %p1702_p9 }
 0x37f   : > { %1710 = shalt.err (!%p1707_p13)
}
 0x380   : > { %1618 = dma.vmem_to_hbm [thread:$0]  (%p1847_p4), %s1302_s10, 128, %s1299_s17, %s1287_s18  }
 0x381 PF: > { %p1624_p0 = scmp.ge.s32.totalorder %s1761_s29, 2  ;;  %s1313_s16 = sand.u32 1, %s1741_s24  }
 0x382   : > { %s1314_s21 = scalar_lea.sflag [#allocation5], %s1313_s16 }
 0x383   : > { %p1621_p1 = pnand %p1624_p0, %p1854_p8 }
 0x385   : > { %p1622_p2 = pneg %p1621_p1 }
 0x387   : > { %1736 = dma.done.wait (%p1622_p2), %s1314_s21, 128  }
 0x388   : > { %1738 = vsyncadd (%p1622_p2), %s1314_s21, 4294967168  ;;  %s20_s29 = sadd.s32 1, %s1761_s29   ;;  %s2132_s24 = smov %s1745_s25 }
 0x389   : > { %p17_p3 = scmp.ge.s32.totalorder %s20_s29, 4   ;;  %s2133_s25 = smov %s1749_s26 }
 0x38a   : > { %s2134_s26 = smov %s1860_s14  ;;  %s2135_s27 = smov %s1757_s28 }
 0x38b   : > { %s2136_s28 = smov %s2138_s9  ;;  %19 = sbr.rel (!%p17_p3) target bundleno = 4 (0x4), region = 97 }
 0x390   :  { %1319 = vsyncpa [#allocation5], 1 }
 0x391   :  { %1321 = vsyncpa [#allocation5 + $0x1], 1 }

</bundles_post_ra>
